<compile_context>
chip_gen: v5e
topology: v5e:2x2
jax: 0.10.0
libtpu: 0.0.40
codegen_flags: <defaults>
</compile_context>

<pallas_src>
import numpy as np
import jax
import jax.numpy as jnp
from jax.experimental import pallas as pl
from jax.experimental.pallas import tpu as pltpu


def _round_up(x, m):
    return (x + m - 1) // m * m


def _vmem_params():
    """(compiler vmem_limit_bytes, tile-picker budget) derived from the chip."""
    phys = 64 * 1024 * 1024                         # conservative default (v7x)
    try:
        phys = int(pltpu.get_tpu_info().vmem_capacity_bytes)
    except Exception:
        pass
    # ~48 MiB on v7x (64 MiB physical), ~96 MiB on v5e/v6e (128 MiB physical).
    limit = min(phys * 3 // 4, phys - 8 * 1024 * 1024)
    limit = max(limit, 32 * 1024 * 1024)
    budget = max(limit - 10 * 1024 * 1024, 16 * 1024 * 1024)
    return int(limit), int(budget)


def _choose_tile_n(n, din, demb_p, in_bytes, mm_bytes, budget_bytes):
    """Pick TILE_N.  Single tile if the whole problem fits the VMEM budget;
    otherwise a multiple of 128 (lane-dense d block legality) sized so each
    grid step moves >= ~4 MiB of input DMA."""
    n8 = _round_up(max(n, 8), 8)

    def vmem_need(t):
        x_in = 2 * 2 * t * din * in_bytes                 # 2 inputs x 2 pipeline bufs
        d_out = 2 * t * 4                                  # lane-dense d, 2 bufs
        w = 2 * din * demb_p * mm_bytes                    # resident W (charged 2x: default dbl-buf)
        work = t * (din * (4 + mm_bytes) + demb_p * 8)     # diff_f32 + cast + emb + square
        return x_in + d_out + w + work

    if vmem_need(n8) <= budget_bytes:
        return n8                                          # whole problem in one tile

    target = max(128, (4 * 1024 * 1024) // max(1, 2 * din * in_bytes))
    t = min(_round_up(target, 128), _round_up(n8, 128), 8192)
    t = max(128, (t // 128) * 128)
    while t > 128 and vmem_need(t) > budget_bytes:
        t -= 128
    return t


def _emb_dist_kernel(xf_ref, xt_ref, w_ref, d_ref):
    # xf_ref, xt_ref: (TILE_N, Din)   raw inputs (original dtype, unpadded Din)
    # w_ref:          (Din, Demb_p)   resident weight, matmul dtype
    # d_ref:          (1, TILE_N) f32 lane-dense squared-Euclidean distances
    diff_in = xt_ref[...].astype(jnp.float32) - xf_ref[...].astype(jnp.float32)
    diff_emb = jnp.dot(diff_in.astype(w_ref.dtype), w_ref[...],
                       preferred_element_type=jnp.float32)
    d = jnp.sum(diff_emb * diff_emb, axis=1)               # (TILE_N,)
    d_ref[...] = d.reshape(d_ref.shape)                    # (1, TILE_N), unmasked vst


def run_kernel(inputs_from, inputs_to, weight, *, tile_n=None,
               matmul_dtype=jnp.bfloat16):
    """Returns d[N] (f32): squared Euclidean distance per (from, to) pair."""
    N, Din = inputs_from.shape
    Demb = weight.shape[1]
    demb_p = _round_up(Demb, 128)
    in_bytes = jnp.dtype(inputs_from.dtype).itemsize
    mm_bytes = jnp.dtype(matmul_dtype).itemsize

    vmem_limit, vmem_budget = _vmem_params()
    if tile_n is None:
        tile_n = _choose_tile_n(N, Din, demb_p, in_bytes, mm_bytes, vmem_budget)
    n_pad = _round_up(max(N, tile_n), tile_n)
    num_tiles = n_pad // tile_n
    if num_tiles > 1:
        assert tile_n % 128 == 0, (
            "multi-tile TILE_N must be a multiple of 128 (lane-dense d block)")

    # Only a (cheap) row-pad of the inputs when N is not a tile multiple; no
    # Din padding, no stacking, no dtype-cast copy of the big x streams.
    xf, xt = inputs_from, inputs_to
    if n_pad != N:
        xf = jnp.pad(xf, ((0, n_pad - N), (0, 0)))
        xt = jnp.pad(xt, ((0, n_pad - N), (0, 0)))

    # W is tiny: pad Demb to a lane multiple (zero columns are exact for the
    # distance sum) and cast to the MXU operand dtype.
    w_p = jnp.pad(weight, ((0, 0), (0, demb_p - Demb))).astype(matmul_dtype)

    d = pl.pallas_call(
        _emb_dist_kernel,
        out_shape=jax.ShapeDtypeStruct((1, n_pad), jnp.float32),
        grid=(num_tiles,),
        in_specs=[
            pl.BlockSpec((tile_n, Din), lambda i: (i, 0)),
            pl.BlockSpec((tile_n, Din), lambda i: (i, 0)),
            pl.BlockSpec((Din, demb_p), lambda i: (0, 0)),   # resident W
        ],
        out_specs=pl.BlockSpec((1, tile_n), lambda i: (0, i)),
        compiler_params=pltpu.CompilerParams(
            # No cross-tile carry (negsum is reduced in the wrapper), so the
            # grid axis is parallel -> megacore sharding on v7x.
            dimension_semantics=("parallel",),
            vmem_limit_bytes=vmem_limit,
        ),
    )(xf, xt, w_p)
    return d[0, :N]


def simple_euclidean_emb_loss(inputs_from, inputs_to, weight, status_host, *,
                              matmul_dtype=jnp.bfloat16):
    """Mirrors SimpleEuclideanEmbLoss.forward for phase != 'train'."""
    status_np = np.asarray(status_host)
    d_all = run_kernel(inputs_from, inputs_to, weight, matmul_dtype=matmul_dtype)

    # Host-static index partition (PyTorch uses (status == k).nonzero()).
    pos_idx = np.where(status_np == 1)[0]
    neg_idx = np.where(status_np == 0)[0]

    d_pos = d_all[pos_idx]
    d_neg = d_all[neg_idx]
    d_uu = jnp.zeros_like(d_pos)                      # d(u, u) is exactly 0

    negsum = jnp.sum(jnp.exp(-d_neg))                 # O(N) wrapper reduction
    loss = d_pos + jnp.log(negsum + jnp.exp(-d_uu))

    # Eval branch leaves the *_all embedding tensors empty in PyTorch.
    empty = jnp.zeros((0,), dtype=jnp.float32)
    return empty, empty, loss, d_pos, d_neg


if __name__ == "__main__":
    key = jax.random.PRNGKey(0)
    k1, k2, k3 = jax.random.split(key, 3)

    N, D_in, D_emb = 8, 32, 16
    inputs_from = jax.random.normal(k1, (N, D_in), dtype=jnp.float32)
    inputs_to = jax.random.normal(k2, (N, D_in), dtype=jnp.float32)
    weight = jax.random.normal(k3, (D_in, D_emb), dtype=jnp.float32) * 0.1
    status = np.array([1, 1, 0, 0, 1, 0, 1, 0], dtype=np.int32)

    # Pure-JAX f32 reference.
    fe_ref = inputs_from @ weight
    te_ref = inputs_to @ weight
    d_ref = jnp.sum((te_ref - fe_ref) ** 2, axis=1)
    pos_idx = np.where(status == 1)[0]
    neg_idx = np.where(status == 0)[0]
    loss_ref = d_ref[pos_idx] + jnp.log(
        jnp.sum(jnp.exp(-d_ref[neg_idx]))
        + jnp.exp(-jnp.zeros_like(d_ref[pos_idx])))

    # Exact-parity path: f32 MXU operands.
    outs = simple_euclidean_emb_loss(inputs_from, inputs_to, weight, status,
                                     matmul_dtype=jnp.float32)
    outs = jax.block_until_ready(outs)
    emb_from_all, emb_to_all, loss, d_pos, d_neg = outs
    np.testing.assert_allclose(np.asarray(d_pos), np.asarray(d_ref[pos_idx]),
                               rtol=1e-5, atol=1e-5)
    np.testing.assert_allclose(np.asarray(d_neg), np.asarray(d_ref[neg_idx]),
                               rtol=1e-5, atol=1e-5)
    np.testing.assert_allclose(np.asarray(loss), np.asarray(loss_ref),
                               rtol=1e-5, atol=1e-5)
    assert emb_from_all.shape == (0,) and emb_to_all.shape == (0,)

    # Default fast path: bf16 MXU operands, f32 accumulation (loose tolerance
    # expected by construction).
    outs_bf16 = jax.block_until_ready(
        simple_euclidean_emb_loss(inputs_from, inputs_to, weight, status))
    _, _, loss_b, d_pos_b, d_neg_b = outs_bf16
    np.testing.assert_allclose(np.asarray(d_pos_b), np.asarray(d_ref[pos_idx]),
                               rtol=1e-1, atol=1e-1)
    np.testing.assert_allclose(np.asarray(d_neg_b), np.asarray(d_ref[neg_idx]),
                               rtol=1e-1, atol=1e-1)
    np.testing.assert_allclose(np.asarray(loss_b), np.asarray(loss_ref),
                               rtol=1e-1, atol=1e-1)

    # TODO(synk): the 'train' branch (networkx graph walks + random.choice
    # negative sampling) is host-side Python control flow with no Pallas
    # equivalent; only the eval-phase projection/distance/loss math is kernelized.
    print("KERNEL_OK")
</pallas_src>

<mosaic_0001>
module attributes {stable_mosaic.version = 11 : i64} {
  func.func @_emb_dist_kernel(%arg0: i32, %arg1: memref<8x32xf32, #tpu.memory_space<vmem>>, %arg2: memref<8x32xf32, #tpu.memory_space<vmem>>, %arg3: memref<32x128xf32, #tpu.memory_space<vmem>>, %arg4: memref<1x8xf32, #tpu.memory_space<vmem>>) attributes {dimension_semantics = [#tpu.dimension_semantics<parallel>], iteration_bounds = array<i64: 1>, scalar_prefetch = 0 : i64, scratch_operands = 0 : i64, tpu.core_type = #tpu.core_type<tc>, window_params = [{transform_indices = @transform_0, window_bounds = array<i64: 8, 32>}, {transform_indices = @transform_1, window_bounds = array<i64: 8, 32>}, {pipeline_mode = #tpu.pipeline_mode<synchronous>, transform_indices = @transform_2, window_bounds = array<i64: 32, 128>}, {transform_indices = @transform_3, window_bounds = array<i64: 1, 8>}]} {
    %c0 = arith.constant 0 : index
    %c0_0 = arith.constant 0 : index
    %0 = vector.load %arg2[%c0, %c0_0] : memref<8x32xf32, #tpu.memory_space<vmem>>, vector<8x32xf32>
    %c0_1 = arith.constant 0 : index
    %c0_2 = arith.constant 0 : index
    %1 = vector.load %arg1[%c0_1, %c0_2] : memref<8x32xf32, #tpu.memory_space<vmem>>, vector<8x32xf32>
    %2 = arith.subf %0, %1 : vector<8x32xf32>
    %c0_3 = arith.constant 0 : index
    %c0_4 = arith.constant 0 : index
    %3 = vector.load %arg3[%c0_3, %c0_4] : memref<32x128xf32, #tpu.memory_space<vmem>>, vector<32x128xf32>
    %cst = arith.constant dense<0.000000e+00> : vector<8x128xf32>
    %4 = tpu.matmul %2, %3, %cst {dimension_numbers = #tpu.dot_dimension_numbers<[1], [0], [0], [1], [0, 0, 1, 1], [], []>} : vector<8x32xf32>, vector<32x128xf32>, vector<8x128xf32> -> vector<8x128xf32>
    %5 = arith.mulf %4, %4 : vector<8x128xf32>
    %cst_5 = arith.constant dense<0.000000e+00> : vector<8xf32>
    %6 = vector.multi_reduction <add>, %5, %cst_5 [1] : vector<8x128xf32> to vector<8xf32>
    %7 = vector.shape_cast %6 : vector<8xf32> to vector<1x8xf32>
    %c0_6 = arith.constant 0 : index
    %c0_7 = arith.constant 0 : index
    %8 = vector.load %arg4[%c0_6, %c0_7] : memref<1x8xf32, #tpu.memory_space<vmem>>, vector<1x8xf32>
    tpu.vector_store %arg4[%c0_6, %c0_7], %7 {strides = array<i32>} : memref<1x8xf32, #tpu.memory_space<vmem>>, vector<1x8xf32>,
    return
  }
  func.func @transform_0(%arg0: i32) -> (i32, i32) {
    %c0_i32 = arith.constant 0 : i32
    %c0_i32_0 = arith.constant 0 : i32
    return %arg0, %c0_i32 : i32, i32
  }
  func.func @transform_1(%arg0: i32) -> (i32, i32) {
    %c0_i32 = arith.constant 0 : i32
    %c0_i32_0 = arith.constant 0 : i32
    return %arg0, %c0_i32 : i32, i32
  }
  func.func @transform_2(%arg0: i32) -> (i32, i32) {
    %c0_i32 = arith.constant 0 : i32
    %c0_i32_0 = arith.constant 0 : i32
    %c0_i32_1 = arith.constant 0 : i32
    return %c0_i32, %c0_i32_0 : i32, i32
  }
  func.func @transform_3(%arg0: i32) -> (i32, i32) {
    %c0_i32 = arith.constant 0 : i32
    %c0_i32_0 = arith.constant 0 : i32
    return %c0_i32, %arg0 : i32, i32
  }
}

</mosaic_0001>

<bundles_post_ra>
// kernel: tpu_custom_call.1
= control target key start
LH: loop header
LB: loop body
LE: loop exit
PB: predicated region body
PF: predicated region fallthrough
CT: control target
= control target key end

     0   :  { %8 = vsyncpa [#allocation3], 0  ;;  %s264_s0 = inlined_call_operand.hbm [shape: f32[8,32], index: 0, kind: input, shape index: {}]   ;;  %s265_s1 = inlined_call_operand.hbm [shape: f32[8,32], index: 1, kind: input, shape index: {}]   ;;  %s266_s2 = inlined_call_operand.hbm [shape: f32[32,128], index: 2, kind: input, shape index: {}]   ;;  %s267_s3 = inlined_call_operand.hbm [shape: f32[1,8], index: 3, kind: output, shape index: {}]  }
   0x1   :  { %9 = vsyncpa [#allocation6], 0  ;;  %s27_s14 = sshll.u32 %s265_s1, 4  ;;  %s28_s14 = int_to_ptr.hbm [resolvable:$true] %s27_s14 }
   0x2   :  { %10 = vsyncpa [#allocation4], 0  ;;  %s226_s15 = smov [#allocation5]   ;;  %s16_s19 = sshll.u32 %s264_s0, 4  ;;  %s17_s19 = int_to_ptr.hbm [resolvable:$true] %s16_s19 }
   0x3   :  { %s29_s16 = sshll.u32 %s226_s15, 4  ;;  %s227_s20 = smov [#allocation2]   ;;  %s30_s16 = int_to_ptr.vmem [resolvable:$true] %s29_s16 }
   0x4   :  { %32 = dma.hbm_to_vmem [thread:$0]  %s28_s14, 128, %s30_s16, [#allocation6]  }
   0x5   :  { %s18_s21 = sshll.u32 %s227_s20, 4  ;;  %s37_s24 = sshll.u32 %s266_s2, 4  ;;  %s19_s21 = int_to_ptr.vmem [resolvable:$true] %s18_s21  ;;  %s38_s24 = int_to_ptr.hbm [resolvable:$true] %s37_s24 }
   0x6   :  { %21 = dma.hbm_to_vmem [thread:$0]  %s17_s19, 128, %s19_s21, [#allocation3]  }
   0x7   :  { %s228_s1 = smov [#allocation7]   ;;  %s229_s26 = smov 128  }
   0x8   :  { %s39_s25 = sshll.u32 %s228_s1, 4  ;;  %s230_s27 = smov 8   ;;  %s40_s25 = int_to_ptr.vmem [resolvable:$true] %s39_s25 }
   0x9   :  { %45 = dma.hbm_to_vmem [thread:$0]  %s38_s24, 512, %s40_s25, [#allocation6], %s229_s26, %s229_s26, %s230_s27  }
   0xa   :  { %220 = dma.done.wait [#allocation3], 128  }
   0xb   :  { %221 = vsyncadd [#allocation3], 4294967168 }
   0xc   :  { %222 = dma.done.wait [#allocation6], 640  }
   0xd   :  { %223 = vsyncadd [#allocation6], 4294966656  ;;  %v64_v0 = vld [vmem:[#allocation7 + $0x18] sm:$0xff]  ;;  %v63_v1 = vld [vmem:[#allocation7 + $0x10] sm:$0xff]  ;;  %vm65_vm0 = vcmask 261120   ;;  %v93_v9 = vlaneseq  ;;  %s231_s0 = smov [#allocation8]  }
   0xe   :  { %81 = vmatpush.msra.mxu0 %v64_v0  ;;  %v58_v2 = vld [vmem:[#allocation5] sm:$0xff]  ;;  %v59_v3 = vld [vmem:[#allocation2] sm:$0xff]  ;;  %v62_v4 = vld [vmem:[#allocation7 + $0x8] sm:$0xff]  ;;  %s104_s2 = sshll.u32 %s231_s0, 4  ;;  %s106_s30 = sshll.u32 %s267_s3, 4  ;;  %vm97_vm1 = vcmask 57344   ;;  %s105_s2 = int_to_ptr.vmem [resolvable:$true] %s104_s2  ;;  %s107_s30 = int_to_ptr.hbm [resolvable:$true] %s106_s30 }
   0xf   :  { %v61_v5 = vld [vmem:[#allocation7] sm:$0xff]  ;;  %v60_v6 = vsub.f32 %v58_v2, %v59_v3  ;;  %v94_v10 = vand.u32 127, %v93_v9 }
  0x10   :  { %82 = vmatpush.msra.mxu0 %v63_v1 }
  0x12   :  { %83 = vmatpush.msra.mxu0 %v62_v4 }
  0x14   :  { %84 = vmatpush.msra.mxu0 %v61_v5 }
  0x15   :  { %117 = vmatmul.msk.f32.vlgmr.msra.gmra.mxu0 %vm65_vm0, %v60_v6 }
  0x92   :  { %v86_v7 = vpop.f32.mrf.mxu0 }
  0x93   :  { %v89_v8 = vmul.f32 %v86_v7, %v86_v7 }
  0x95   :  { %90 = vadd.xlane.f32.xlu0 %v89_v8 }
 0x108   :  { %v91_v11 = vpop.xlane.xlu0 %90 }
 0x109   :  { %v95_v12 = vperm.slane %v91_v11, %v94_v10 }
 0x10b   :  { %98 = vst.msk [vmem:[#allocation8] sm:$0x1] %vm97_vm1, %v95_v12 }
 0x10c   :  { %109 = dma.vmem_to_hbm [thread:$0]  %s105_s2, 16, %s107_s30, [#allocation4]  }
 0x10d   :  { %224 = dma.done.wait [#allocation4], 16  }
 0x10e   :  { %225 = vsyncadd [#allocation4], 4294967280 }
 0x10f   :  { %114 = vsyncpa [#allocation3], 1 }
 0x110   :  { %115 = vsyncpa [#allocation6], 1 }
 0x111   :  { %116 = vsyncpa [#allocation4], 1 }

</bundles_post_ra>
